<compile_context>
chip_gen: v6e
topology: v6e:2x2x1
jax: 0.10.0
libtpu: 0.0.40
codegen_flags: <defaults>
</compile_context>

<pallas_src>
import functools

import jax
import jax.numpy as jnp
from jax.experimental import pallas as pl
from jax.experimental.pallas import tpu as pltpu

_LANE = 128
_MiB = 1024 * 1024


def _round_up(x, m):
    return ((x + m - 1) // m) * m


def actor_kernel(x_ref,
                 w1_ref, b1_ref,
                 w2_ref, b2_ref,
                 w3_ref, b3_ref,
                 w4_ref, b4_ref,
                 out_ref):
    """Fused MLP forward: 3x (Linear -> ReLU), Linear, tanh.

    Matmuls run on the MXU in the weights' dtype (f32 or bf16) with f32
    accumulation; bias add / ReLU (VPU) and tanh (EUP) stay in f32.
    """
    x = x_ref[...]

    h = jnp.dot(x.astype(w1_ref.dtype), w1_ref[...],
                preferred_element_type=jnp.float32) + b1_ref[...]
    h = jnp.maximum(h, 0.0)

    h = jnp.dot(h.astype(w2_ref.dtype), w2_ref[...],
                preferred_element_type=jnp.float32) + b2_ref[...]
    h = jnp.maximum(h, 0.0)

    h = jnp.dot(h.astype(w3_ref.dtype), w3_ref[...],
                preferred_element_type=jnp.float32) + b3_ref[...]
    h = jnp.maximum(h, 0.0)

    h = jnp.dot(h.astype(w4_ref.dtype), w4_ref[...],
                preferred_element_type=jnp.float32) + b4_ref[...]

    out_ref[...] = jnp.tanh(h).astype(out_ref.dtype)


@functools.partial(jax.jit, static_argnames=("block_b", "use_bf16_weights"))
def actor_forward(state, params, block_b=None, use_bf16_weights=False):
    """Runs the fused Actor forward pass via pallas_call.

    state : (B, state_dim) float32
    params: dict of w1..w4 (in, out) and b1..b4 (1, out) float32 arrays.
    block_b: batch tile; None -> whole batch if B<=2048 else 2048-row tiles.
    use_bf16_weights: feed bf16 weights to the MXU (f32 accumulation).
    """
    B, state_dim = state.shape
    w1, b1 = params["w1"], params["b1"]
    w2, b2 = params["w2"], params["b2"]
    w3, b3 = params["w3"], params["b3"]
    w4, b4 = params["w4"], params["b4"]
    mid_dim = w1.shape[1]
    action_dim = w4.shape[1]

    # --- lane-dense output: pad final layer to a multiple of 128 lanes ------
    out_pad = _round_up(action_dim, _LANE)
    if out_pad != action_dim:
        w4 = jnp.pad(w4, ((0, 0), (0, out_pad - action_dim)))
        b4 = jnp.pad(b4, ((0, 0), (0, out_pad - action_dim)))

    if use_bf16_weights:
        w1, w2, w3, w4 = (w.astype(jnp.bfloat16) for w in (w1, w2, w3, w4))

    # --- batch tile selection (single grid step for small/medium batches) ---
    if block_b is None:
        block_b = B if B <= 2048 else 2048
    block_b = min(block_b, B)
    if block_b < B:
        block_b = _round_up(block_b, 8)  # sublane alignment on the tiled axis
    Bp = _round_up(B, block_b)
    x = state if Bp == B else jnp.pad(state, ((0, Bp - B), (0, 0)))
    grid = (Bp // block_b,)

    # --- explicit VMEM estimate -> vmem_limit_bytes (keeps v7x happy) -------
    w_bytes = 2 if use_bf16_weights else 4
    weight_elems = (state_dim * mid_dim + 2 * mid_dim * mid_dim
                    + mid_dim * out_pad)
    weight_bytes = weight_elems * w_bytes
    bias_bytes = (3 * mid_dim + out_pad) * 4
    act_bytes = block_b * (state_dim + out_pad) * 4          # in/out tiles
    inter_bytes = 4 * block_b * mid_dim * 4                  # live hidden acts
    est = 2 * (weight_bytes + bias_bytes + act_bytes) + inter_bytes
    vmem_limit = int(min(max(2 * est, 32 * _MiB), 48 * _MiB))

    # --- advisory cost estimate for the XLA scheduler ------------------------
    flops = 2 * Bp * (state_dim * mid_dim + 2 * mid_dim * mid_dim
                      + mid_dim * out_pad) + 4 * Bp * mid_dim
    bytes_accessed = (Bp * state_dim * 4 + Bp * out_pad * 4
                      + weight_bytes + bias_bytes)
    cost = pl.CostEstimate(flops=int(flops),
                           transcendentals=int(Bp * out_pad),
                           bytes_accessed=int(bytes_accessed))

    x_spec = pl.BlockSpec((block_b, state_dim), lambda i: (i, 0))

    def full_spec(shape):
        # Constant index_map: weight/bias blocks stay resident across steps.
        return pl.BlockSpec(shape, lambda i: (0, 0))

    out = pl.pallas_call(
        actor_kernel,
        out_shape=jax.ShapeDtypeStruct((Bp, out_pad), jnp.float32),
        grid_spec=pltpu.PrefetchScalarGridSpec(
            num_scalar_prefetch=0,
            grid=grid,
            in_specs=[
                x_spec,
                full_spec(w1.shape), full_spec(b1.shape),
                full_spec(w2.shape), full_spec(b2.shape),
                full_spec(w3.shape), full_spec(b3.shape),
                full_spec(w4.shape), full_spec(b4.shape),
            ],
            out_specs=pl.BlockSpec((block_b, out_pad), lambda i: (i, 0)),
        ),
        compiler_params=pltpu.CompilerParams(
            dimension_semantics=("parallel",),
            vmem_limit_bytes=vmem_limit),
        cost_estimate=cost,
    )(x, w1, b1, w2, b2, w3, b3, w4, b4)

    return out[:B, :action_dim]


def init_actor_params(key, state_dim, mid_dim, action_dim):
    """Deterministic synthetic parameters (shapes match the nn.Linear layers)."""
    dims = [(state_dim, mid_dim),
            (mid_dim, mid_dim),
            (mid_dim, mid_dim),
            (mid_dim, action_dim)]
    params = {}
    for idx, (d_in, d_out) in enumerate(dims, start=1):
        key, kw, kb = jax.random.split(key, 3)
        bound = 1.0 / jnp.sqrt(jnp.float32(d_in))  # PyTorch-default-like range
        params[f"w{idx}"] = jax.random.uniform(
            kw, (d_in, d_out), jnp.float32, -bound, bound)
        params[f"b{idx}"] = jax.random.uniform(
            kb, (1, d_out), jnp.float32, -bound, bound)
    return params


def actor_forward_ref(state, params):
    """Plain-JAX reference for correctness checking."""
    h = jnp.maximum(state @ params["w1"] + params["b1"], 0.0)
    h = jnp.maximum(h @ params["w2"] + params["b2"], 0.0)
    h = jnp.maximum(h @ params["w3"] + params["b3"], 0.0)
    return jnp.tanh(h @ params["w4"] + params["b4"])


if __name__ == "__main__":
    # Small shapes consistent with the module: Actor(mid_dim, state_dim, action_dim)
    B, state_dim, mid_dim, action_dim = 16, 16, 32, 4

    key = jax.random.PRNGKey(0)
    key_x, key_p, key_xl = jax.random.split(key, 3)
    state = jax.random.normal(key_x, (B, state_dim), jnp.float32)
    params = init_actor_params(key_p, state_dim, mid_dim, action_dim)

    # Small batch: whole batch in one grid step, single lane-dense store.
    out = jax.block_until_ready(actor_forward(state, params))
    ref = actor_forward_ref(state, params)
    assert out.shape == (B, action_dim)
    assert jnp.max(jnp.abs(out - ref)) < 1e-5

    # Larger batch exercises the tiled (grid > 1) path with 2048-row tiles
    # (also the path that shards across both TensorCores on v7x).
    B_large = 4096
    state_l = jax.random.normal(key_xl, (B_large, state_dim), jnp.float32)
    out_l = jax.block_until_ready(actor_forward(state_l, params))
    ref_l = actor_forward_ref(state_l, params)
    assert out_l.shape == (B_large, action_dim)
    assert jnp.max(jnp.abs(out_l - ref_l)) < 1e-5

    # Explicit small tile + non-divisible batch exercises the padding path.
    out_t = jax.block_until_ready(actor_forward(state_l[:1000], params, block_b=256))
    assert out_t.shape == (1000, action_dim)
    assert jnp.max(jnp.abs(out_t - ref_l[:1000])) < 1e-5

    # bf16-weight MXU path (v6e/v7x throughput lever); looser tolerance.
    out_bf16 = jax.block_until_ready(
        actor_forward(state, params, use_bf16_weights=True))
    assert jnp.max(jnp.abs(out_bf16 - ref)) < 3e-2

    # TODO(synk): get_action's torch.randn_like noise path is stochastic glue;
    # only the deterministic forward (net(state).tanh()) is implemented here.
    print("KERNEL_OK")
</pallas_src>

<mosaic_0001>
module attributes {stable_mosaic.version = 11 : i64} {
  func.func @actor_kernel(%arg0: i32, %arg1: memref<16x16xf32, #tpu.memory_space<vmem>>, %arg2: memref<16x32xf32, #tpu.memory_space<vmem>>, %arg3: memref<1x32xf32, #tpu.memory_space<vmem>>, %arg4: memref<32x32xf32, #tpu.memory_space<vmem>>, %arg5: memref<1x32xf32, #tpu.memory_space<vmem>>, %arg6: memref<32x32xf32, #tpu.memory_space<vmem>>, %arg7: memref<1x32xf32, #tpu.memory_space<vmem>>, %arg8: memref<32x128xf32, #tpu.memory_space<vmem>>, %arg9: memref<1x128xf32, #tpu.memory_space<vmem>>, %arg10: memref<16x128xf32, #tpu.memory_space<vmem>>) attributes {dimension_semantics = [#tpu.dimension_semantics<parallel>], iteration_bounds = array<i64: 1>, scalar_prefetch = 0 : i64, scratch_operands = 0 : i64, tpu.core_type = #tpu.core_type<tc>, window_params = [{transform_indices = @transform_0, window_bounds = array<i64: 16, 16>}, {pipeline_mode = #tpu.pipeline_mode<synchronous>, transform_indices = @transform_1, window_bounds = array<i64: 16, 32>}, {pipeline_mode = #tpu.pipeline_mode<synchronous>, transform_indices = @transform_2, window_bounds = array<i64: 1, 32>}, {pipeline_mode = #tpu.pipeline_mode<synchronous>, transform_indices = @transform_3, window_bounds = array<i64: 32, 32>}, {pipeline_mode = #tpu.pipeline_mode<synchronous>, transform_indices = @transform_4, window_bounds = array<i64: 1, 32>}, {pipeline_mode = #tpu.pipeline_mode<synchronous>, transform_indices = @transform_5, window_bounds = array<i64: 32, 32>}, {pipeline_mode = #tpu.pipeline_mode<synchronous>, transform_indices = @transform_6, window_bounds = array<i64: 1, 32>}, {pipeline_mode = #tpu.pipeline_mode<synchronous>, transform_indices = @transform_7, window_bounds = array<i64: 32, 128>}, {pipeline_mode = #tpu.pipeline_mode<synchronous>, transform_indices = @transform_8, window_bounds = array<i64: 1, 128>}, {transform_indices = @transform_9, window_bounds = array<i64: 16, 128>}]} {
    %c0 = arith.constant 0 : index
    %c0_0 = arith.constant 0 : index
    %0 = vector.load %arg1[%c0, %c0_0] : memref<16x16xf32, #tpu.memory_space<vmem>>, vector<16x16xf32>
    %c0_1 = arith.constant 0 : index
    %c0_2 = arith.constant 0 : index
    %1 = vector.load %arg2[%c0_1, %c0_2] : memref<16x32xf32, #tpu.memory_space<vmem>>, vector<16x32xf32>
    %cst = arith.constant dense<0.000000e+00> : vector<16x32xf32>
    %2 = tpu.matmul %0, %1, %cst {dimension_numbers = #tpu.dot_dimension_numbers<[1], [0], [0], [1], [0, 0, 1, 1], [], []>} : vector<16x16xf32>, vector<16x32xf32>, vector<16x32xf32> -> vector<16x32xf32>
    %c0_3 = arith.constant 0 : index
    %c0_4 = arith.constant 0 : index
    %3 = vector.load %arg3[%c0_3, %c0_4] : memref<1x32xf32, #tpu.memory_space<vmem>>, vector<1x32xf32>
    %4 = vector.broadcast %3 : vector<1x32xf32> to vector<16x32xf32>
    %5 = arith.addf %2, %4 : vector<16x32xf32>
    %cst_5 = arith.constant 0.000000e+00 : f32
    %6 = vector.broadcast %cst_5 : f32 to vector<16x32xf32>
    %7 = arith.maximumf %5, %6 : vector<16x32xf32>
    %c0_6 = arith.constant 0 : index
    %c0_7 = arith.constant 0 : index
    %8 = vector.load %arg4[%c0_6, %c0_7] : memref<32x32xf32, #tpu.memory_space<vmem>>, vector<32x32xf32>
    %cst_8 = arith.constant dense<0.000000e+00> : vector<16x32xf32>
    %9 = tpu.matmul %7, %8, %cst_8 {dimension_numbers = #tpu.dot_dimension_numbers<[1], [0], [0], [1], [0, 0, 1, 1], [], []>} : vector<16x32xf32>, vector<32x32xf32>, vector<16x32xf32> -> vector<16x32xf32>
    %c0_9 = arith.constant 0 : index
    %c0_10 = arith.constant 0 : index
    %10 = vector.load %arg5[%c0_9, %c0_10] : memref<1x32xf32, #tpu.memory_space<vmem>>, vector<1x32xf32>
    %11 = vector.broadcast %10 : vector<1x32xf32> to vector<16x32xf32>
    %12 = arith.addf %9, %11 : vector<16x32xf32>
    %cst_11 = arith.constant 0.000000e+00 : f32
    %13 = vector.broadcast %cst_11 : f32 to vector<16x32xf32>
    %14 = arith.maximumf %12, %13 : vector<16x32xf32>
    %c0_12 = arith.constant 0 : index
    %c0_13 = arith.constant 0 : index
    %15 = vector.load %arg6[%c0_12, %c0_13] : memref<32x32xf32, #tpu.memory_space<vmem>>, vector<32x32xf32>
    %cst_14 = arith.constant dense<0.000000e+00> : vector<16x32xf32>
    %16 = tpu.matmul %14, %15, %cst_14 {dimension_numbers = #tpu.dot_dimension_numbers<[1], [0], [0], [1], [0, 0, 1, 1], [], []>} : vector<16x32xf32>, vector<32x32xf32>, vector<16x32xf32> -> vector<16x32xf32>
    %c0_15 = arith.constant 0 : index
    %c0_16 = arith.constant 0 : index
    %17 = vector.load %arg7[%c0_15, %c0_16] : memref<1x32xf32, #tpu.memory_space<vmem>>, vector<1x32xf32>
    %18 = vector.broadcast %17 : vector<1x32xf32> to vector<16x32xf32>
    %19 = arith.addf %16, %18 : vector<16x32xf32>
    %cst_17 = arith.constant 0.000000e+00 : f32
    %20 = vector.broadcast %cst_17 : f32 to vector<16x32xf32>
    %21 = arith.maximumf %19, %20 : vector<16x32xf32>
    %c0_18 = arith.constant 0 : index
    %c0_19 = arith.constant 0 : index
    %22 = vector.load %arg8[%c0_18, %c0_19] : memref<32x128xf32, #tpu.memory_space<vmem>>, vector<32x128xf32>
    %cst_20 = arith.constant dense<0.000000e+00> : vector<16x128xf32>
    %23 = tpu.matmul %21, %22, %cst_20 {dimension_numbers = #tpu.dot_dimension_numbers<[1], [0], [0], [1], [0, 0, 1, 1], [], []>} : vector<16x32xf32>, vector<32x128xf32>, vector<16x128xf32> -> vector<16x128xf32>
    %c0_21 = arith.constant 0 : index
    %c0_22 = arith.constant 0 : index
    %24 = vector.load %arg9[%c0_21, %c0_22] : memref<1x128xf32, #tpu.memory_space<vmem>>, vector<1x128xf32>
    %25 = vector.broadcast %24 : vector<1x128xf32> to vector<16x128xf32>
    %26 = arith.addf %23, %25 : vector<16x128xf32>
    %27 = math.tanh %26 : vector<16x128xf32>
    %c0_23 = arith.constant 0 : index
    %c0_24 = arith.constant 0 : index
    %28 = vector.load %arg10[%c0_23, %c0_24] : memref<16x128xf32, #tpu.memory_space<vmem>>, vector<16x128xf32>
    tpu.vector_store %arg10[%c0_23, %c0_24], %27 {strides = array<i32>} : memref<16x128xf32, #tpu.memory_space<vmem>>, vector<16x128xf32>,
    return
  }
  func.func @transform_0(%arg0: i32) -> (i32, i32) {
    %c0_i32 = arith.constant 0 : i32
    %c0_i32_0 = arith.constant 0 : i32
    return %arg0, %c0_i32 : i32, i32
  }
  func.func @transform_1(%arg0: i32) -> (i32, i32) {
    %c0_i32 = arith.constant 0 : i32
    %c0_i32_0 = arith.constant 0 : i32
    %c0_i32_1 = arith.constant 0 : i32
    return %c0_i32, %c0_i32_0 : i32, i32
  }
  func.func @transform_2(%arg0: i32) -> (i32, i32) {
    %c0_i32 = arith.constant 0 : i32
    %c0_i32_0 = arith.constant 0 : i32
    %c0_i32_1 = arith.constant 0 : i32
    return %c0_i32, %c0_i32_0 : i32, i32
  }
  func.func @transform_3(%arg0: i32) -> (i32, i32) {
    %c0_i32 = arith.constant 0 : i32
    %c0_i32_0 = arith.constant 0 : i32
    %c0_i32_1 = arith.constant 0 : i32
    return %c0_i32, %c0_i32_0 : i32, i32
  }
  func.func @transform_4(%arg0: i32) -> (i32, i32) {
    %c0_i32 = arith.constant 0 : i32
    %c0_i32_0 = arith.constant 0 : i32
    %c0_i32_1 = arith.constant 0 : i32
    return %c0_i32, %c0_i32_0 : i32, i32
  }
  func.func @transform_5(%arg0: i32) -> (i32, i32) {
    %c0_i32 = arith.constant 0 : i32
    %c0_i32_0 = arith.constant 0 : i32
    %c0_i32_1 = arith.constant 0 : i32
    return %c0_i32, %c0_i32_0 : i32, i32
  }
  func.func @transform_6(%arg0: i32) -> (i32, i32) {
    %c0_i32 = arith.constant 0 : i32
    %c0_i32_0 = arith.constant 0 : i32
    %c0_i32_1 = arith.constant 0 : i32
    return %c0_i32, %c0_i32_0 : i32, i32
  }
  func.func @transform_7(%arg0: i32) -> (i32, i32) {
    %c0_i32 = arith.constant 0 : i32
    %c0_i32_0 = arith.constant 0 : i32
    %c0_i32_1 = arith.constant 0 : i32
    return %c0_i32, %c0_i32_0 : i32, i32
  }
  func.func @transform_8(%arg0: i32) -> (i32, i32) {
    %c0_i32 = arith.constant 0 : i32
    %c0_i32_0 = arith.constant 0 : i32
    %c0_i32_1 = arith.constant 0 : i32
    return %c0_i32, %c0_i32_0 : i32, i32
  }
  func.func @transform_9(%arg0: i32) -> (i32, i32) {
    %c0_i32 = arith.constant 0 : i32
    %c0_i32_0 = arith.constant 0 : i32
    return %arg0, %c0_i32 : i32, i32
  }
}

</mosaic_0001>

<bundles_post_ra>
// kernel: actor_forward.1
= control target key start
LH: loop header
LB: loop body
LE: loop exit
PB: predicated region body
PF: predicated region fallthrough
CT: control target
= control target key end

     0   :  { %vm43_vm0 = vcmask 130048   ;;  %vm138_vm1 = vcmask 261120   ;;  %s616_s1 = inlined_call_operand.vmem [shape: f32[16,32], index: 1, kind: input, shape index: {}]   ;;  %s617_s0 = inlined_call_operand.vmem [shape: f32[16,16], index: 0, kind: input, shape index: {}]   ;;  %s618_s3 = inlined_call_operand.vmem [shape: f32[32,32], index: 3, kind: input, shape index: {}]   ;;  %s619_s2 = inlined_call_operand.vmem [shape: f32[1,32], index: 2, kind: input, shape index: {}]   ;;  %s620_s5 = inlined_call_operand.vmem [shape: f32[32,32], index: 5, kind: input, shape index: {}]   ;;  %s621_s4 = inlined_call_operand.vmem [shape: f32[1,32], index: 4, kind: input, shape index: {}]   ;;  %s622_s7 = inlined_call_operand.vmem [shape: f32[32,128], index: 7, kind: input, shape index: {}]   ;;  %s623_s6 = inlined_call_operand.vmem [shape: f32[1,32], index: 6, kind: input, shape index: {}]   ;;  %s624_s8 = inlined_call_operand.vmem [shape: f32[1,128], index: 8, kind: input, shape index: {}]   ;;  %s625_s9 = inlined_call_operand.vmem [shape: f32[16,128], index: 9, kind: output, shape index: {}]  }
   0x1   :  { %v35_v0 = vld [vmem:[%s616_s1 + $0x8] sm:$0xff]  ;;  %v34_v1 = vld [vmem:[%s616_s1] sm:$0xff]  ;;  %v130_v4 = vld [vmem:[%s618_s3 + $0x18] sm:$0xff] }
   0x2   :  { %v32_v2 = vld [vmem:[%s617_s0] sm:$0xff]  ;;  %450 = vmatprep.subr.mxu0 %v35_v0  ;;  %v33_v3 = vld [vmem:[%s617_s0 + $0x8] sm:$0xff]  ;;  %457 = vmatprep.subr.mxu1 %v130_v4  ;;  %v129_v5 = vld [vmem:[%s618_s3 + $0x10] sm:$0xff] }
   0x3   :  { %454 = vmatprep.mubr.msk.f32.mxu0 %vm43_vm0, %v32_v2  ;;  %451 = vmatpush3.msra.mxu0 %v35_v0  ;;  %v128_v6 = vld [vmem:[%s618_s3 + $0x8] sm:$0xff]  ;;  %v127_v7 = vld [vmem:[%s618_s3] sm:$0xff]  ;;  %v225_v15 = vld [vmem:[%s620_s5 + $0x18] sm:$0xff] }
   0x4   :  { %452 = vmatprep.subr.mxu0 %v34_v1  ;;  %458 = vmatpush3.msra.mxu1 %v130_v4  ;;  %v416_v8 = vld [vmem:[%s619_s2] ss:$0 sm:$0xff]  ;;  %v224_v16 = vld [vmem:[%s620_s5 + $0x10] sm:$0xff]  ;;  %v223_v17 = vld [vmem:[%s620_s5 + $0x8] sm:$0xff] }
   0x5   :  { %453 = vmatpush3.msra.mxu0 %v34_v1  ;;  %459 = vmatprep.subr.mxu1 %v129_v5  ;;  %v222_v18 = vld [vmem:[%s620_s5] sm:$0xff]  ;;  %v319_v26 = vld [vmem:[%s622_s7 + $0x18] sm:$0xff]  ;;  %v318_v27 = vld [vmem:[%s622_s7 + $0x10] sm:$0xff] }
   0x6   :  { %455 = vmatmul.mubr.msk.f32.vlgmr.msra.gmra.mxu0 %vm43_vm0, %v33_v3  ;;  %460 = vmatpush3.msra.mxu1 %v129_v5  ;;  %v419_v19 = vld [vmem:[%s621_s4] ss:$0 sm:$0xff]  ;;  %v317_v28 = vld [vmem:[%s622_s7 + $0x8] sm:$0xff] }
   0x7   :  { %461 = vmatprep.subr.mxu1 %v128_v6  ;;  %468 = vmatprep.subr.mxu0 %v225_v15  ;;  %v316_v29 = vld [vmem:[%s622_s7] sm:$0xff] }
   0x8   :  { %462 = vmatpush3.msra.mxu1 %v128_v6  ;;  %469 = vmatpush3.msra.mxu0 %v225_v15  ;;  %v422_v30 = vld [vmem:[%s623_s6] ss:$0 sm:$0xff] }
   0x9   :  { %463 = vmatprep.subr.mxu1 %v127_v7  ;;  %470 = vmatprep.subr.mxu0 %v224_v16  ;;  %v425_v37 = vld [vmem:[%s624_s8] ss:$0 sm:$0xff] }
   0xa   :  { %464 = vmatpush3.msra.mxu1 %v127_v7  ;;  %471 = vmatpush3.msra.mxu0 %v224_v16 }
   0xb   :  { %472 = vmatprep.subr.mxu0 %v223_v17  ;;  %479 = vmatprep.subr.mxu1 %v319_v26 }
   0xc   :  { %473 = vmatpush3.msra.mxu0 %v223_v17 }
   0xd   :  { %474 = vmatprep.subr.mxu0 %v222_v18 }
   0xe   :  { %475 = vmatpush3.msra.mxu0 %v222_v18 }
  0xc6   :  { %v456_v9 = vpop.f32.mrf.mxu0 }
  0xc7   :  { %v122_v10 = vadd.f32 %v456_v9, %v416_v8 }
  0xc8   :  { %v116_v11 = vpop.f32.mrf.mxu0 }
  0xc9   :  { %v117_v12 = vadd.f32 %v416_v8, %v116_v11  ;;  %v126_v14 = vmax.f32 %v122_v10, 0.0 }
  0xcb   :  { %v125_v13 = vmax.f32 %v117_v12, 0.0 }
  0xcd   :  { %465 = vmatprep.mubr.msk.f32.mxu1 %vm138_vm1, %v125_v13 }
  0xce   :  { %466 = vmatmul.mubr.msk.f32.vlgmr.msra.gmra.mxu1 %vm138_vm1, %v126_v14 }
  0xcf   :  { %480 = vmatpush3.msra.mxu1 %v319_v26 }
  0xd0   :  { %481 = vmatprep.subr.mxu1 %v318_v27 }
  0xd1   :  { %482 = vmatpush3.msra.mxu1 %v318_v27 }
  0xd2   :  { %483 = vmatprep.subr.mxu1 %v317_v28 }
  0xd3   :  { %484 = vmatpush3.msra.mxu1 %v317_v28 }
  0xd4   :  { %485 = vmatprep.subr.mxu1 %v316_v29 }
  0xd5   :  { %486 = vmatpush3.msra.mxu1 %v316_v29 }
 0x18e   :  { %v467_v20 = vpop.f32.mrf.mxu1 }
 0x18f   :  { %v217_v21 = vadd.f32 %v467_v20, %v419_v19 }
 0x190   :  { %v211_v22 = vpop.f32.mrf.mxu1 }
 0x191   :  { %v212_v23 = vadd.f32 %v419_v19, %v211_v22  ;;  %v221_v25 = vmax.f32 %v217_v21, 0.0 }
 0x193   :  { %v220_v24 = vmax.f32 %v212_v23, 0.0 }
 0x195   :  { %476 = vmatprep.mubr.msk.f32.mxu0 %vm138_vm1, %v220_v24 }
 0x196   :  { %477 = vmatmul.mubr.msk.f32.vlgmr.msra.gmra.mxu0 %vm138_vm1, %v221_v25 }
 0x256   :  { %v478_v31 = vpop.f32.mrf.mxu0 }
 0x257   :  { %v311_v32 = vadd.f32 %v478_v31, %v422_v30 }
 0x258   :  { %v305_v33 = vpop.f32.mrf.mxu0 }
 0x259   :  { %v306_v34 = vadd.f32 %v422_v30, %v305_v33  ;;  %v315_v36 = vmax.f32 %v311_v32, 0.0 }
 0x25b   :  { %v314_v35 = vmax.f32 %v306_v34, 0.0 }
 0x25d   :  { %487 = vmatprep.mubr.msk.f32.mxu1 %vm138_vm1, %v314_v35 }
 0x25e   :  { %488 = vmatmul.mubr.msk.f32.vlgmr.msra.gmra.mxu1 %vm138_vm1, %v315_v36 }
 0x31e   :  { %v489_v38 = vpop.f32.mrf.mxu1 }
 0x31f   :  { %v405_v39 = vadd.f32 %v489_v38, %v425_v37 }
 0x320   :  { %v399_v40 = vpop.f32.mrf.mxu1 }
 0x321   :  { %490 = vtanh.f32 %v405_v39  ;;  %v400_v41 = vadd.f32 %v425_v37, %v399_v40 }
 0x323   :  { %492 = vtanh.f32 %v400_v41 }
 0x32e   :  { %v491_v42 = vpop.eup %490 }
 0x32f   :  { %411 = vst [vmem:[%s625_s9 + $0x8] sm:$0xff] %v491_v42 }
 0x330   :  { %v493_v43 = vpop.eup %492 }
 0x331   :  { %410 = vst [vmem:[%s625_s9] sm:$0xff] %v493_v43 }

</bundles_post_ra>
